<compile_context>
chip_gen: v5e
topology: v5e:2x2
jax: 0.10.0
libtpu: 0.0.40
codegen_flags: <defaults>
</compile_context>

<pallas_src>
import functools
import math

import jax
import jax.numpy as jnp
from jax import lax
from jax.experimental import pallas as pl
from jax.experimental.pallas import tpu as pltpu


def _whittle_kernel(x_ref, w1_ref, b1_ref, w2_ref, b2_ref, o_ref, *,
                    inv_state_size, row_chunk):
    tile_b = x_ref.shape[0]
    n_chunks = tile_b // row_chunk  # static; row_chunk divides tile_b by construction

    # Weights are VMEM-resident across grid steps (constant index_map).
    w1 = w1_ref[...]          # [1, H]
    b1 = b1_ref[...]          # [1, H]
    w2 = w2_ref[...]          # [1, H]
    b2 = b2_ref[0]            # scalar from SMEM (scalar path)

    def body(c, carry):
        r = pl.multiple_of(c * row_chunk, row_chunk)
        # [RC, 1] rows of the batch tile, scaled.
        xr = x_ref[pl.ds(r, row_chunk), :].astype(jnp.float32) * inv_state_size
        # fc1 as broadcast multiply (K=1 contraction == elementwise): [RC, H]
        hr = jnp.maximum(xr * w1 + b1, 0.0)
        # fc2 as elementwise mul + lane reduce: [RC, 1]
        yr = jnp.sum(hr * w2, axis=-1, keepdims=True) + b2
        o_ref[pl.ds(r, row_chunk), :] = yr.astype(o_ref.dtype)
        return carry

    # fori_loop (not a Python for) bounds live ranges; unroll small trip counts
    # fully, larger ones partially, so the LLO scheduler still sees the body.
    unroll = True if n_chunks <= 8 else 8
    lax.fori_loop(0, n_chunks, body, 0, unroll=unroll)


def whittle_forward(x, w1, b1, w2, b2, *, state_size, max_tile_b=1024):
    """x: [B,1]; w1: [1,H]; b1: [1,H]; w2: [1,H]; b2: [1] -> out [B,1]."""
    B = x.shape[0]
    H = w1.shape[1]

    def round_up(a, m):
        return ((a + m - 1) // m) * m

    # Batch tile: multiple of 8 (sublanes), capped so per-step VMEM stays tiny
    # even at v5e's 16 MiB scoped / v7x's 64 MiB physical limits.
    tile_b = min(max_tile_b, round_up(max(B, 1), 8))
    # Row chunk: multiple of 8 that divides tile_b (<= 32 rows per inner step).
    row_chunk = math.gcd(tile_b, 32)

    padded_b = round_up(B, tile_b)
    if padded_b != B:
        x = jnp.pad(x, ((0, padded_b - B), (0, 0)))
    grid = (padded_b // tile_b,)

    kernel = functools.partial(
        _whittle_kernel,
        inv_state_size=1.0 / float(state_size),
        row_chunk=row_chunk,
    )
    # TODO(synk): if state_size varies at runtime, pass 1/state_size as an SMEM
    # scalar (like b2) instead of baking it in via functools.partial.

    out = pl.pallas_call(
        kernel,
        out_shape=jax.ShapeDtypeStruct((padded_b, 1), jnp.float32),
        grid=grid,
        in_specs=[
            pl.BlockSpec((tile_b, 1), lambda i: (i, 0)),                 # x tile
            pl.BlockSpec((1, H), lambda i: (0, 0)),                      # w1 (resident)
            pl.BlockSpec((1, H), lambda i: (0, 0)),                      # b1 (resident)
            pl.BlockSpec((1, H), lambda i: (0, 0)),                      # w2 (resident)
            pl.BlockSpec(memory_space=pltpu.MemorySpace.SMEM),           # b2 scalar
        ],
        out_specs=pl.BlockSpec((tile_b, 1), lambda i: (i, 0)),
        compiler_params=pltpu.CompilerParams(
            dimension_semantics=("parallel",),  # shards batch axis on v7x's 2 TCs
        ),
    )(x, w1, b1, w2, b2)

    return out[:B]


def init_params(key, fc1_unit=1024):
    """Deterministic xavier_uniform-like init (matches init_weights semantics)."""
    k1, k2 = jax.random.split(key)

    # fc1: PyTorch weight [H, 1]; xavier bound = sqrt(6 / (fan_in + fan_out))
    fan_in1, fan_out1 = 1, fc1_unit
    bound1 = (6.0 / (fan_in1 + fan_out1)) ** 0.5
    w1_pt = jax.random.uniform(k1, (fc1_unit, 1), jnp.float32, -bound1, bound1)
    b1_pt = jnp.zeros((fc1_unit,), jnp.float32)

    # fc2: PyTorch weight [1, H]
    fan_in2, fan_out2 = fc1_unit, 1
    bound2 = (6.0 / (fan_in2 + fan_out2)) ** 0.5
    w2_pt = jax.random.uniform(k2, (1, fc1_unit), jnp.float32, -bound2, bound2)
    b2_pt = jnp.zeros((1,), jnp.float32)

    # Kernel layout (see header comment): everything lane-dense along H.
    w1 = w1_pt.T                      # [1, H]
    b1 = b1_pt.reshape(1, fc1_unit)   # [1, H]
    w2 = w2_pt                        # [1, H]
    b2 = b2_pt                        # [1]   (SMEM scalar)
    return w1, b1, w2, b2


def reference_forward(x, w1, b1, w2, b2, state_size):
    xs = x / state_size
    h = jnp.maximum(xs @ w1 + b1, 0.0)          # [B, H]
    return h @ w2.T + b2.reshape(1, 1)          # [B, 1]


if __name__ == "__main__":
    state_size = 100.0
    fc1_unit = 1024
    B = 8

    key = jax.random.PRNGKey(0)
    kx, kp = jax.random.split(key)

    # state_batch: [B, 1] (e.g. integer-like states in [0, state_size))
    x = jax.random.uniform(kx, (B, 1), jnp.float32, 0.0, state_size)
    w1, b1, w2, b2 = init_params(kp, fc1_unit)

    out = whittle_forward(x, w1, b1, w2, b2, state_size=state_size)
    out = jax.block_until_ready(out)

    ref = reference_forward(x, w1, b1, w2, b2, state_size)
    assert out.shape == (B, 1)
    assert jnp.allclose(out, ref, atol=1e-5, rtol=1e-5), (out, ref)

    print("KERNEL_OK")
</pallas_src>

<mosaic_0001>
module attributes {stable_mosaic.version = 11 : i64} {
  func.func @_whittle_kernel(%arg0: i32, %arg1: memref<8x1xf32, #tpu.memory_space<vmem>>, %arg2: memref<1x1024xf32, #tpu.memory_space<vmem>>, %arg3: memref<1x1024xf32, #tpu.memory_space<vmem>>, %arg4: memref<1x1024xf32, #tpu.memory_space<vmem>>, %arg5: memref<1xf32, #tpu.memory_space<smem>>, %arg6: memref<8x1xf32, #tpu.memory_space<vmem>>) attributes {dimension_semantics = [#tpu.dimension_semantics<parallel>], iteration_bounds = array<i64: 1>, scalar_prefetch = 0 : i64, scratch_operands = 0 : i64, tpu.core_type = #tpu.core_type<tc>, window_params = [{transform_indices = @transform_0, window_bounds = array<i64: 8, 1>}, {pipeline_mode = #tpu.pipeline_mode<synchronous>, transform_indices = @transform_1, window_bounds = array<i64: 1, 1024>}, {pipeline_mode = #tpu.pipeline_mode<synchronous>, transform_indices = @transform_2, window_bounds = array<i64: 1, 1024>}, {pipeline_mode = #tpu.pipeline_mode<synchronous>, transform_indices = @transform_3, window_bounds = array<i64: 1, 1024>}, {transform_indices = @transform_4, window_bounds = array<i64: 1>}, {transform_indices = @transform_5, window_bounds = array<i64: 8, 1>}]} {
    %c0 = arith.constant 0 : index
    %c0_0 = arith.constant 0 : index
    %0 = vector.load %arg2[%c0, %c0_0] : memref<1x1024xf32, #tpu.memory_space<vmem>>, vector<1x1024xf32>
    %c0_1 = arith.constant 0 : index
    %c0_2 = arith.constant 0 : index
    %1 = vector.load %arg3[%c0_1, %c0_2] : memref<1x1024xf32, #tpu.memory_space<vmem>>, vector<1x1024xf32>
    %c0_3 = arith.constant 0 : index
    %c0_4 = arith.constant 0 : index
    %2 = vector.load %arg4[%c0_3, %c0_4] : memref<1x1024xf32, #tpu.memory_space<vmem>>, vector<1x1024xf32>
    %c0_5 = arith.constant 0 : index
    %3 = memref.load %arg5[%c0_5] : memref<1xf32, #tpu.memory_space<smem>>
    %c0_i32 = arith.constant 0 : i32
    %c8_i32 = arith.constant 8 : i32
    %4 = arith.muli %c0_i32, %c8_i32 : i32
    %5 = tpu.assume_multiple %4, 8 : i32
    %6 = arith.index_cast %5 : i32 to index
    %c0_6 = arith.constant 0 : index
    %7 = vector.load %arg1[%6, %c0_6] : memref<8x1xf32, #tpu.memory_space<vmem>>, vector<8x1xf32>
    %cst = arith.constant 0.00999999977 : f32
    %8 = vector.broadcast %cst : f32 to vector<8x1xf32>
    %9 = arith.mulf %7, %8 : vector<8x1xf32>
    %10 = vector.broadcast %9 : vector<8x1xf32> to vector<8x1024xf32>
    %11 = vector.broadcast %0 : vector<1x1024xf32> to vector<8x1024xf32>
    %12 = arith.mulf %10, %11 : vector<8x1024xf32>
    %13 = vector.broadcast %1 : vector<1x1024xf32> to vector<8x1024xf32>
    %14 = arith.addf %12, %13 : vector<8x1024xf32>
    %cst_7 = arith.constant 0.000000e+00 : f32
    %15 = vector.broadcast %cst_7 : f32 to vector<8x1024xf32>
    %16 = arith.maximumf %14, %15 : vector<8x1024xf32>
    %17 = vector.broadcast %2 : vector<1x1024xf32> to vector<8x1024xf32>
    %18 = arith.mulf %16, %17 : vector<8x1024xf32>
    %cst_8 = arith.constant dense<0.000000e+00> : vector<8xf32>
    %19 = vector.multi_reduction <add>, %18, %cst_8 [1] : vector<8x1024xf32> to vector<8xf32>
    %20 = vector.shape_cast %19 : vector<8xf32> to vector<8x1xf32>
    %21 = vector.broadcast %3 : f32 to vector<8x1xf32>
    %22 = arith.addf %20, %21 : vector<8x1xf32>
    %23 = arith.index_cast %5 : i32 to index
    %c0_9 = arith.constant 0 : index
    %24 = vector.load %arg6[%23, %c0_9] : memref<8x1xf32, #tpu.memory_space<vmem>>, vector<8x1xf32>
    tpu.vector_store %arg6[%23, %c0_9], %22 {strides = array<i32>} : memref<8x1xf32, #tpu.memory_space<vmem>>, vector<8x1xf32>,
    %c1_i32 = arith.constant 1 : i32
    return
  }
  func.func @transform_0(%arg0: i32) -> (i32, i32) {
    %c0_i32 = arith.constant 0 : i32
    %c0_i32_0 = arith.constant 0 : i32
    return %arg0, %c0_i32 : i32, i32
  }
  func.func @transform_1(%arg0: i32) -> (i32, i32) {
    %c0_i32 = arith.constant 0 : i32
    %c0_i32_0 = arith.constant 0 : i32
    %c0_i32_1 = arith.constant 0 : i32
    return %c0_i32, %c0_i32_0 : i32, i32
  }
  func.func @transform_2(%arg0: i32) -> (i32, i32) {
    %c0_i32 = arith.constant 0 : i32
    %c0_i32_0 = arith.constant 0 : i32
    %c0_i32_1 = arith.constant 0 : i32
    return %c0_i32, %c0_i32_0 : i32, i32
  }
  func.func @transform_3(%arg0: i32) -> (i32, i32) {
    %c0_i32 = arith.constant 0 : i32
    %c0_i32_0 = arith.constant 0 : i32
    %c0_i32_1 = arith.constant 0 : i32
    return %c0_i32, %c0_i32_0 : i32, i32
  }
  func.func @transform_4(%arg0: i32) -> i32 {
    %c0_i32 = arith.constant 0 : i32
    %c0_i32_0 = arith.constant 0 : i32
    return %c0_i32 : i32
  }
  func.func @transform_5(%arg0: i32) -> (i32, i32) {
    %c0_i32 = arith.constant 0 : i32
    %c0_i32_0 = arith.constant 0 : i32
    return %arg0, %c0_i32 : i32, i32
  }
}

</mosaic_0001>

<bundles_post_ra>
// kernel: tpu_custom_call.1
= control target key start
LH: loop header
LB: loop body
LE: loop exit
PB: predicated region body
PF: predicated region fallthrough
CT: control target
= control target key end

     0   :  { %11 = vsyncpa [#allocation4], 0  ;;  %s269_s0 = inlined_call_operand.vmem [shape: f32[8,1], index: 0, kind: input, shape index: {}]   ;;  %s270_s1 = inlined_call_operand.vmem [shape: f32[1,1024], index: 1, kind: input, shape index: {}]   ;;  %s271_s2 = inlined_call_operand.hbm [shape: f32[1,1024], index: 2, kind: input, shape index: {}]   ;;  %s272_s3 = inlined_call_operand.hbm [shape: f32[1,1024], index: 3, kind: input, shape index: {}]   ;;  %s273_s4 = inlined_call_operand.<no memory space> [shape: f32[1], index: 4, kind: input, shape index: {}]   ;;  %s274_s5 = inlined_call_operand.vmem [shape: f32[8,1], index: 5, kind: output, shape index: {}]  }
   0x1   :  { %s22_s20 = sshll.u32 %s271_s2, 4  ;;  %s23_s20 = int_to_ptr.hbm [resolvable:$true] %s22_s20 }
   0x2   :  { %12 = vsyncpa [#allocation6], 0  ;;  %s218_s21 = smov [#allocation3]   ;;  %s33_s25 = sshll.u32 %s272_s3, 4  ;;  %s34_s25 = int_to_ptr.hbm [resolvable:$true] %s33_s25 }
   0x3   :  { %s24_s22 = sshll.u32 %s218_s21, 4  ;;  %s219_s26 = smov [#allocation5]   ;;  %s25_s22 = int_to_ptr.vmem [resolvable:$true] %s24_s22 }
   0x4   :  { %27 = dma.hbm_to_vmem [thread:$0]  %s23_s20, 128, %s25_s22, [#allocation4]  }
   0x5   :  { %s35_s27 = sshll.u32 %s219_s26, 4  ;;  %s36_s27 = int_to_ptr.vmem [resolvable:$true] %s35_s27 }
   0x6   :  { %38 = dma.hbm_to_vmem [thread:$0]  %s34_s25, 128, %s36_s27, [#allocation6]  }
   0x7   :  { %214 = dma.done.wait [#allocation4], 128  }
   0x8   :  { %215 = vsyncadd [#allocation4], 4294967168 }
   0x9   :  { %216 = dma.done.wait [#allocation6], 128  }
   0xa   :  { %217 = vsyncadd [#allocation6], 4294967168  ;;  %v220_v0 = vmov 0   ;;  %v53_v1 = vld [vmem:[%s269_s0] sm:$0xff]  ;;  %v51_v11 = vld [vmem:[#allocation5] sm:$0xff]  ;;  %vm154_vm0 = vcmask 7168  }
   0xb   :  { %165 = vset.pattern.permute.xlu0 %v220_v0  ;;  %v54_v2 = vmul.f32 0.01, %v53_v1  ;;  %v49_v3 = vld [vmem:[%s270_s1] sm:$0xff]  ;;  %v119_v27 = vperm.slane %v51_v11, 0  ;;  %v120_v28 = vperm.slane %v51_v11, 1  ;;  %v121_v35 = vperm.slane %v51_v11, 2 }
   0xc   :  { %v50_v4 = vld [vmem:[#allocation3] sm:$0xff]  ;;  %v61_v5 = vperm.slane %v49_v3, 0  ;;  %v62_v6 = vperm.slane %v49_v3, 1  ;;  %v63_v7 = vperm.slane %v49_v3, 2  ;;  %v64_v8 = vperm.slane %v49_v3, 3 }
   0xd   :  { %57 = vperm.xlu0 %165, %v54_v2   ;;  %v65_v9 = vperm.slane %v49_v3, 4  ;;  %v66_v10 = vperm.slane %v49_v3, 5  ;;  %v86_v12 = vperm.slane %v50_v4, 0  ;;  %v87_v13 = vperm.slane %v50_v4, 1 }
   0xe   :  { %v88_v14 = vperm.slane %v50_v4, 2  ;;  %v89_v15 = vperm.slane %v50_v4, 3  ;;  %v67_v17 = vperm.slane %v49_v3, 6  ;;  %v68_v18 = vperm.slane %v49_v3, 7 }
   0xf   :  { %v90_v19 = vperm.slane %v50_v4, 4  ;;  %v91_v20 = vperm.slane %v50_v4, 5  ;;  %v92_v34 = vperm.slane %v50_v4, 6  ;;  %v93_v41 = vperm.slane %v50_v4, 7 }
  0x10   :  { %v122_v42 = vperm.slane %v51_v11, 3  ;;  %v123_v47 = vperm.slane %v51_v11, 4  ;;  %v124_v52 = vperm.slane %v51_v11, 5  ;;  %v125_v58 = vperm.slane %v51_v11, 6 }
  0x11   :  { %v126_v62 = vperm.slane %v51_v11, 7 }
  0x7f   :  { %v58_v16 = vpop.permute.xlu0 %57 }
  0x80   :  { %v77_v21 = vmul.f32 %v61_v5, %v58_v16  ;;  %v78_v22 = vmul.f32 %v62_v6, %v58_v16  ;;  %v79_v23 = vmul.f32 %v63_v7, %v58_v16  ;;  %v80_v24 = vmul.f32 %v64_v8, %v58_v16 }
  0x81   :  { %v81_v25 = vmul.f32 %v65_v9, %v58_v16  ;;  %v82_v26 = vmul.f32 %v66_v10, %v58_v16  ;;  %v83_v33 = vmul.f32 %v67_v17, %v58_v16  ;;  %v84_v40 = vmul.f32 %v68_v18, %v58_v16 }
  0x82   :  { %v102_v29 = vadd.f32 %v86_v12, %v77_v21  ;;  %v103_v30 = vadd.f32 %v87_v13, %v78_v22  ;;  %v104_v31 = vadd.f32 %v88_v14, %v79_v23  ;;  %v105_v32 = vadd.f32 %v89_v15, %v80_v24 }
  0x83   :  { %v106_v36 = vadd.f32 %v90_v19, %v81_v25  ;;  %v107_v43 = vadd.f32 %v91_v20, %v82_v26  ;;  %v108_v48 = vadd.f32 %v92_v34, %v83_v33  ;;  %v109_v53 = vadd.f32 %v93_v41, %v84_v40 }
  0x84   :  { %v110_v37 = vmax.f32 %v102_v29, 0.0  ;;  %v111_v38 = vmax.f32 %v103_v30, 0.0  ;;  %v112_v39 = vmax.f32 %v104_v31, 0.0  ;;  %v113_v44 = vmax.f32 %v105_v32, 0.0 }
  0x85   :  { %v114_v49 = vmax.f32 %v106_v36, 0.0  ;;  %v115_v54 = vmax.f32 %v107_v43, 0.0  ;;  %v116_v57 = vmax.f32 %v108_v48, 0.0  ;;  %v117_v61 = vmax.f32 %v109_v53, 0.0 }
  0x86   :  { %v135_v45 = vmul.f32 %v119_v27, %v110_v37  ;;  %v136_v46 = vmul.f32 %v120_v28, %v111_v38  ;;  %v137_v50 = vmul.f32 %v121_v35, %v112_v39  ;;  %v138_v55 = vmul.f32 %v122_v42, %v113_v44 }
  0x87   :  { %v139_v59 = vmul.f32 %v123_v47, %v114_v49  ;;  %v140_v63 = vmul.f32 %v124_v52, %v115_v54  ;;  %v141_v1 = vmul.f32 %v125_v58, %v116_v57  ;;  %v142_v3 = vmul.f32 %v126_v62, %v117_v61 }
  0x88   :  { %v143_v51 = vadd.f32 %v136_v46, %v135_v45  ;;  %v152_v6 = vstv %s273_s4 }
  0x8a   :  { %v144_v56 = vadd.f32 %v143_v51, %v137_v50 }
  0x8c   :  { %v145_v60 = vadd.f32 %v144_v56, %v138_v55 }
  0x8e   :  { %v146_v0 = vadd.f32 %v145_v60, %v139_v59 }
  0x90   :  { %v147_v2 = vadd.f32 %v146_v0, %v140_v63 }
  0x92   :  { %v148_v4 = vadd.f32 %v147_v2, %v141_v1 }
  0x94   :  { %v149_v5 = vadd.f32 %v148_v4, %v142_v3 }
  0x96   :  { %150 = vadd.xlane.f32.xlu0 %v149_v5 }
 0x109   :  { %v151_v7 = vpop.xlane.xlu0 %150 }
 0x10a   :  { %v153_v8 = vadd.f32 %v152_v6, %v151_v7 }
 0x10c   :  { %155 = vst.msk [vmem:[%s274_s5] sm:$0xff] %vm154_vm0, %v153_v8 }
 0x10d   :  { %160 = vsyncpa [#allocation4], 1 }
 0x10e   :  { %161 = vsyncpa [#allocation6], 1 }

</bundles_post_ra>
